<compile_context>
chip_gen: v6e
topology: v6e:2x2x1
jax: 0.10.0
libtpu: 0.0.40
codegen_flags: <defaults>
</compile_context>

<pallas_src>
import functools

import jax
import jax.numpy as jnp
from jax import lax
from jax.experimental import pallas as pl
from jax.experimental.pallas import tpu as pltpu


def _prenorm_linear_kernel(x_ref, g_ref, beta_ref, w_ref, b_ref, o_ref,
                           xn_ref, acc_ref, *, eps):
    """out = LayerNorm(x) @ W + b, tiled over (M, N, K); K == hidden.

    x_ref    : (tm, H)       input rows (full hidden — needed for the norm)
    g_ref    : (1, H)        LayerNorm gamma (f32)
    beta_ref : (1, H)        LayerNorm beta  (f32)
    w_ref    : (tk, tn)      weight tile (bf16)
    b_ref    : (1, tn)       bias tile (f32)
    o_ref    : (tm, tn)      output tile
    xn_ref   : (nk, tm, tk)  bf16 scratch: normalized rows, chunked along K
    acc_ref  : (tm, tn)      f32 accumulator
    """
    j = pl.program_id(1)
    k = pl.program_id(2)
    nk, _, tk = xn_ref.shape  # static: (H // tk, tm, tk)

    # LayerNorm once per row block (i): only at the first (j, k) step.
    # Requires the j axis to be "arbitrary" (sequential per core) so every j
    # tile handled by this core sees the scratch written at j == 0.
    @pl.when(jnp.logical_and(j == 0, k == 0))
    def _():
        # f32 statistics over the full hidden axis (PyTorch: biased variance).
        x = x_ref[...].astype(jnp.float32)                     # (tm, H)
        mean = jnp.mean(x, axis=-1, keepdims=True)
        xc = x - mean
        var = jnp.mean(xc * xc, axis=-1, keepdims=True)
        inv = lax.rsqrt(var + eps)
        xn = (xc * inv * g_ref[...] + beta_ref[...]).astype(xn_ref.dtype)
        for kk in range(nk):                                   # static unroll
            xn_ref[kk] = xn[:, kk * tk:(kk + 1) * tk]

    @pl.when(k == 0)
    def _():
        acc_ref[...] = jnp.zeros_like(acc_ref)

    # k-th chunk of the normalized rows (leading-axis index: no lane-dim
    # dynamic slice in the hot loop), accumulated on the MXU in f32.
    acc_ref[...] += jnp.dot(xn_ref[k], w_ref[...],
                            preferred_element_type=jnp.float32)

    @pl.when(k == nk - 1)
    def _():
        # Bias epilogue once per output tile, in f32, then cast to out dtype.
        o_ref[...] = (acc_ref[...] + b_ref[...]).astype(o_ref.dtype)


def _pick_vmem_limit_bytes():
    """~75% of physical VMEM, capped at 96 MiB.

    v5e/v6e (128 MiB physical) -> 96 MiB; v7x (64 MiB per TC) -> 48 MiB.
    Falls back to the conservative 48 MiB if the query is unavailable.
    """
    try:
        cap = pltpu.get_tpu_info().vmem_capacity_bytes
    except Exception:
        cap = 64 << 20
    return int(min(96 << 20, (cap * 3) // 4))


def prenorm_linear(x2d, gamma2d, beta2d, w_bf16, b2d, *, eps=1e-5,
                   tile_m=512, tile_n=512, tile_k=1024, vmem_limit_bytes=None):
    """x2d: (M, H); gamma2d/beta2d/b2d: (1, H) f32; w_bf16: (H, H) bf16.

    Returns (M, H) = LayerNorm(x2d; gamma, beta, eps) @ W + b in x2d.dtype.
    """
    M, H = x2d.shape
    assert w_bf16.shape == (H, H)
    assert gamma2d.shape == (1, H) and beta2d.shape == (1, H) and b2d.shape == (1, H)

    # Degrade gracefully to full-dim blocks at small sizes (always legal);
    # large sizes use 128-aligned, lane-dense tiles.
    tm = M if M <= tile_m else tile_m
    tn = H if H <= tile_n else tile_n
    tk = H if H <= tile_k else tile_k
    assert M % tm == 0 and H % tn == 0 and H % tk == 0
    assert tm == M or tm % 8 == 0
    nk = H // tk

    # Read x in bf16: halves the HBM read of x and the dominant (tm, H) VMEM
    # buffers; mean/var are still computed in f32 inside the kernel.
    x_in = x2d.astype(jnp.bfloat16) if x2d.dtype == jnp.float32 else x2d

    # x's index map depends only on i; when there are inner j/k steps to hide
    # its DMA behind, single-buffer it so the large (tm, H) block is not
    # double-buffered (the key lever for v7x's 64 MiB/TC VMEM budget).
    if (H // tn) > 1 or nk > 1:
        x_spec = pl.BlockSpec((tm, H), lambda i, j, k: (i, 0),
                              pipeline_mode=pl.Buffered(1))
    else:
        x_spec = pl.BlockSpec((tm, H), lambda i, j, k: (i, 0))

    if vmem_limit_bytes is None:
        vmem_limit_bytes = _pick_vmem_limit_bytes()

    kernel = functools.partial(_prenorm_linear_kernel, eps=eps)
    out_itemsize = jnp.dtype(x2d.dtype).itemsize

    return pl.pallas_call(
        kernel,
        out_shape=jax.ShapeDtypeStruct((M, H), x2d.dtype),
        grid_spec=pltpu.PrefetchScalarGridSpec(
            num_scalar_prefetch=0,
            grid=(M // tm, H // tn, nk),
            in_specs=[
                x_spec,                                          # x rows (full hidden)
                pl.BlockSpec((1, H), lambda i, j, k: (0, 0)),    # gamma (resident)
                pl.BlockSpec((1, H), lambda i, j, k: (0, 0)),    # beta  (resident)
                pl.BlockSpec((tk, tn), lambda i, j, k: (k, j)),  # weight tile
                pl.BlockSpec((1, tn), lambda i, j, k: (0, j)),   # bias tile
            ],
            out_specs=pl.BlockSpec((tm, tn), lambda i, j, k: (i, j)),
            scratch_shapes=[
                pltpu.VMEM((nk, tm, tk), jnp.bfloat16),  # normalized rows (K-chunked)
                pltpu.VMEM((tm, tn), jnp.float32),       # matmul accumulator
            ],
        ),
        compiler_params=pltpu.CompilerParams(
            # i is the only megacore-parallel axis: the xn scratch is per-core
            # and written only at j == 0, so j/k must stay sequential per core.
            dimension_semantics=("parallel", "arbitrary", "arbitrary"),
            vmem_limit_bytes=int(vmem_limit_bytes),
        ),
        cost_estimate=pl.CostEstimate(
            flops=2 * M * H * H + 8 * M * H,
            transcendentals=M,
            bytes_accessed=M * H * 2 + H * H * 2 + M * H * out_itemsize
                           + 3 * H * 4 + H * 2,
        ),
    )(x_in, gamma2d, beta2d, w_bf16, b2d)


class PreNorm:
    """JAX/Pallas port of PyTorch PreNorm(dim, fn): forward = fn(LayerNorm(x)).

    `fn` is instantiated concretely as a dense layer (weights held by this
    object); LayerNorm + matmul + bias run inside one fused Pallas kernel.
    Parameter casts/reshapes are cached here so no per-forward HBM-sized
    weight cast is issued.
    """

    def __init__(self, gamma, beta, w, b, eps=1e-5):
        H = gamma.shape[0]
        assert beta.shape == (H,) and w.shape == (H, H) and b.shape == (H,)
        self.gamma2d = gamma.reshape(1, H).astype(jnp.float32)
        self.beta2d = beta.reshape(1, H).astype(jnp.float32)
        self.w_bf16 = w.astype(jnp.bfloat16)   # bf16 weights: MXU peak, half DMA/VMEM
        self.b2d = b.reshape(1, H).astype(jnp.float32)
        self.eps = eps

    def __call__(self, x):
        # x: (batch, seq, hidden); LayerNorm over the last (hidden) axis.
        B, S, H = x.shape
        out2d = prenorm_linear(x.reshape(B * S, H), self.gamma2d, self.beta2d,
                               self.w_bf16, self.b2d, eps=self.eps)
        return out2d.reshape(B, S, H)


if __name__ == "__main__":
    key = jax.random.PRNGKey(0)
    kx, kg, kbt, kw, kb = jax.random.split(key, 5)

    batch, seq, hidden = 2, 8, 32
    x = jax.random.normal(kx, (batch, seq, hidden), dtype=jnp.float32)
    # LayerNorm affine params and deterministic "nn.Linear(hidden, hidden)" params.
    gamma = 1.0 + 0.1 * jax.random.normal(kg, (hidden,), dtype=jnp.float32)
    beta = 0.1 * jax.random.normal(kbt, (hidden,), dtype=jnp.float32)
    w = jax.random.normal(kw, (hidden, hidden), dtype=jnp.float32) * 0.05
    b = jax.random.normal(kb, (hidden,), dtype=jnp.float32) * 0.05

    block = PreNorm(gamma, beta, w, b)
    out = jax.block_until_ready(block(x))

    # Reference: LayerNorm (biased var, eps=1e-5) then Linear, in plain f32 JAX.
    mean = jnp.mean(x, axis=-1, keepdims=True)
    var = jnp.mean((x - mean) ** 2, axis=-1, keepdims=True)
    xn = (x - mean) / jnp.sqrt(var + 1e-5) * gamma + beta
    ref = jnp.einsum("bsh,hk->bsk", xn, w) + b

    assert out.shape == x.shape and out.dtype == x.dtype
    # bf16 x / bf16 MXU matmul vs. f32 reference -> loosened tolerance.
    assert jnp.allclose(out, ref, atol=2e-2, rtol=2e-2)

    print("KERNEL_OK")
</pallas_src>

<mosaic_0001>
module attributes {stable_mosaic.version = 11 : i64} {
  func.func @_prenorm_linear_kernel(%arg0: i32, %arg1: i32, %arg2: i32, %arg3: memref<16x32xbf16, #tpu.memory_space<vmem>>, %arg4: memref<1x32xf32, #tpu.memory_space<vmem>>, %arg5: memref<1x32xf32, #tpu.memory_space<vmem>>, %arg6: memref<32x32xbf16, #tpu.memory_space<vmem>>, %arg7: memref<1x32xf32, #tpu.memory_space<vmem>>, %arg8: memref<16x32xf32, #tpu.memory_space<vmem>>, %arg9: memref<1x16x32xbf16, #tpu.memory_space<vmem>>, %arg10: memref<16x32xf32, #tpu.memory_space<vmem>>) attributes {dimension_semantics = [#tpu.dimension_semantics<parallel>, #tpu.dimension_semantics<arbitrary>, #tpu.dimension_semantics<arbitrary>], iteration_bounds = array<i64: 1, 1, 1>, scalar_prefetch = 0 : i64, scratch_operands = 2 : i64, tpu.core_type = #tpu.core_type<tc>, window_params = [{transform_indices = @transform_0, window_bounds = array<i64: 16, 32>}, {pipeline_mode = #tpu.pipeline_mode<synchronous>, transform_indices = @transform_1, window_bounds = array<i64: 1, 32>}, {pipeline_mode = #tpu.pipeline_mode<synchronous>, transform_indices = @transform_2, window_bounds = array<i64: 1, 32>}, {transform_indices = @transform_3, window_bounds = array<i64: 32, 32>}, {transform_indices = @transform_4, window_bounds = array<i64: 1, 32>}, {transform_indices = @transform_5, window_bounds = array<i64: 16, 32>}]} {
    %c0_i32 = arith.constant 0 : i32
    %0 = arith.cmpi eq, %arg1, %c0_i32 : i32
    %c0_i32_0 = arith.constant 0 : i32
    %1 = arith.cmpi eq, %arg2, %c0_i32_0 : i32
    %2 = arith.andi %0, %1 : i1
    %3 = arith.extui %2 : i1 to i32
    %c0_i32_1 = arith.constant 0 : i32
    %4 = arith.cmpi ne, %3, %c0_i32_1 : i32
    scf.if %4 {
      %c0_13 = arith.constant 0 : index
      %c0_14 = arith.constant 0 : index
      %19 = vector.load %arg3[%c0_13, %c0_14] : memref<16x32xbf16, #tpu.memory_space<vmem>>, vector<16x32xbf16>
      %20 = arith.extf %19 : vector<16x32xbf16> to vector<16x32xf32>
      %cst_15 = arith.constant dense<0.000000e+00> : vector<16xf32>
      %21 = vector.multi_reduction <add>, %20, %cst_15 [1] : vector<16x32xf32> to vector<16xf32>
      %22 = vector.shape_cast %21 : vector<16xf32> to vector<16x1xf32>
      %cst_16 = arith.constant 3.200000e+01 : f32
      %23 = vector.broadcast %cst_16 : f32 to vector<16x1xf32>
      %24 = arith.divf %22, %23 : vector<16x1xf32>
      %25 = vector.broadcast %24 : vector<16x1xf32> to vector<16x32xf32>
      %26 = arith.subf %20, %25 : vector<16x32xf32>
      %27 = arith.mulf %26, %26 : vector<16x32xf32>
      %cst_17 = arith.constant dense<0.000000e+00> : vector<16xf32>
      %28 = vector.multi_reduction <add>, %27, %cst_17 [1] : vector<16x32xf32> to vector<16xf32>
      %29 = vector.shape_cast %28 : vector<16xf32> to vector<16x1xf32>
      %cst_18 = arith.constant 3.200000e+01 : f32
      %30 = vector.broadcast %cst_18 : f32 to vector<16x1xf32>
      %31 = arith.divf %29, %30 : vector<16x1xf32>
      %cst_19 = arith.constant 9.99999974E-6 : f32
      %32 = vector.broadcast %cst_19 : f32 to vector<16x1xf32>
      %33 = arith.addf %31, %32 : vector<16x1xf32>
      %34 = math.rsqrt %33 : vector<16x1xf32>
      %35 = vector.broadcast %34 : vector<16x1xf32> to vector<16x32xf32>
      %36 = arith.mulf %26, %35 : vector<16x32xf32>
      %c0_20 = arith.constant 0 : index
      %c0_21 = arith.constant 0 : index
      %37 = vector.load %arg4[%c0_20, %c0_21] : memref<1x32xf32, #tpu.memory_space<vmem>>, vector<1x32xf32>
      %38 = vector.broadcast %37 : vector<1x32xf32> to vector<16x32xf32>
      %39 = arith.mulf %36, %38 : vector<16x32xf32>
      %c0_22 = arith.constant 0 : index
      %c0_23 = arith.constant 0 : index
      %40 = vector.load %arg5[%c0_22, %c0_23] : memref<1x32xf32, #tpu.memory_space<vmem>>, vector<1x32xf32>
      %41 = vector.broadcast %40 : vector<1x32xf32> to vector<16x32xf32>
      %42 = arith.addf %39, %41 : vector<16x32xf32>
      %43 = arith.truncf %42 : vector<16x32xf32> to vector<16x32xbf16>
      %c0_24 = arith.constant 0 : index
      %c0_25 = arith.constant 0 : index
      %c0_26 = arith.constant 0 : index
      %44 = vector.load %arg9[%c0_24, %c0_25, %c0_26] : memref<1x16x32xbf16, #tpu.memory_space<vmem>>, vector<1x16x32xbf16>
      %45 = vector.shape_cast %44 : vector<1x16x32xbf16> to vector<16x32xbf16>
      %46 = vector.shape_cast %43 : vector<16x32xbf16> to vector<1x16x32xbf16>
      tpu.vector_store %arg9[%c0_24, %c0_25, %c0_26], %46 {strides = array<i32>} : memref<1x16x32xbf16, #tpu.memory_space<vmem>>, vector<1x16x32xbf16>,
    } else {
    }
    %c0_i32_2 = arith.constant 0 : i32
    %5 = arith.cmpi eq, %arg2, %c0_i32_2 : i32
    %6 = arith.extui %5 : i1 to i32
    %c0_i32_3 = arith.constant 0 : i32
    %7 = arith.cmpi ne, %6, %c0_i32_3 : i32
    scf.if %7 {
      %cst_13 = arith.constant 0.000000e+00 : f32
      %19 = vector.broadcast %cst_13 : f32 to vector<16x32xf32>
      %c0_14 = arith.constant 0 : index
      %c0_15 = arith.constant 0 : index
      %20 = vector.load %arg10[%c0_14, %c0_15] : memref<16x32xf32, #tpu.memory_space<vmem>>, vector<16x32xf32>
      tpu.vector_store %arg10[%c0_14, %c0_15], %19 {strides = array<i32>} : memref<16x32xf32, #tpu.memory_space<vmem>>, vector<16x32xf32>,
    } else {
    }
    %c0 = arith.constant 0 : index
    %c0_4 = arith.constant 0 : index
    %8 = vector.load %arg10[%c0, %c0_4] : memref<16x32xf32, #tpu.memory_space<vmem>>, vector<16x32xf32>
    %9 = arith.index_cast %arg2 : i32 to index
    %c0_5 = arith.constant 0 : index
    %c0_6 = arith.constant 0 : index
    %10 = vector.load %arg9[%9, %c0_5, %c0_6] : memref<1x16x32xbf16, #tpu.memory_space<vmem>>, vector<1x16x32xbf16>
    %11 = vector.shape_cast %10 : vector<1x16x32xbf16> to vector<16x32xbf16>
    %c0_7 = arith.constant 0 : index
    %c0_8 = arith.constant 0 : index
    %12 = vector.load %arg6[%c0_7, %c0_8] : memref<32x32xbf16, #tpu.memory_space<vmem>>, vector<32x32xbf16>
    %cst = arith.constant dense<0.000000e+00> : vector<16x32xf32>
    %13 = tpu.matmul %11, %12, %cst {dimension_numbers = #tpu.dot_dimension_numbers<[1], [0], [0], [1], [0, 0, 1, 1], [], []>} : vector<16x32xbf16>, vector<32x32xbf16>, vector<16x32xf32> -> vector<16x32xf32>
    %14 = arith.addf %8, %13 : vector<16x32xf32>
    %c0_9 = arith.constant 0 : index
    %c0_10 = arith.constant 0 : index
    %15 = vector.load %arg10[%c0_9, %c0_10] : memref<16x32xf32, #tpu.memory_space<vmem>>, vector<16x32xf32>
    tpu.vector_store %arg10[%c0_9, %c0_10], %14 {strides = array<i32>} : memref<16x32xf32, #tpu.memory_space<vmem>>, vector<16x32xf32>,
    %c0_i32_11 = arith.constant 0 : i32
    %16 = arith.cmpi eq, %arg2, %c0_i32_11 : i32
    %17 = arith.extui %16 : i1 to i32
    %c0_i32_12 = arith.constant 0 : i32
    %18 = arith.cmpi ne, %17, %c0_i32_12 : i32
    scf.if %18 {
      %c0_13 = arith.constant 0 : index
      %c0_14 = arith.constant 0 : index
      %19 = vector.load %arg10[%c0_13, %c0_14] : memref<16x32xf32, #tpu.memory_space<vmem>>, vector<16x32xf32>
      %c0_15 = arith.constant 0 : index
      %c0_16 = arith.constant 0 : index
      %20 = vector.load %arg7[%c0_15, %c0_16] : memref<1x32xf32, #tpu.memory_space<vmem>>, vector<1x32xf32>
      %21 = vector.broadcast %20 : vector<1x32xf32> to vector<16x32xf32>
      %22 = arith.addf %19, %21 : vector<16x32xf32>
      %c0_17 = arith.constant 0 : index
      %c0_18 = arith.constant 0 : index
      %23 = vector.load %arg8[%c0_17, %c0_18] : memref<16x32xf32, #tpu.memory_space<vmem>>, vector<16x32xf32>
      tpu.vector_store %arg8[%c0_17, %c0_18], %22 {strides = array<i32>} : memref<16x32xf32, #tpu.memory_space<vmem>>, vector<16x32xf32>,
    } else {
    }
    return
  }
  func.func @transform_0(%arg0: i32, %arg1: i32, %arg2: i32) -> (i32, i32) {
    %c0_i32 = arith.constant 0 : i32
    %c0_i32_0 = arith.constant 0 : i32
    return %arg0, %c0_i32 : i32, i32
  }
  func.func @transform_1(%arg0: i32, %arg1: i32, %arg2: i32) -> (i32, i32) {
    %c0_i32 = arith.constant 0 : i32
    %c0_i32_0 = arith.constant 0 : i32
    %c0_i32_1 = arith.constant 0 : i32
    return %c0_i32, %c0_i32_0 : i32, i32
  }
  func.func @transform_2(%arg0: i32, %arg1: i32, %arg2: i32) -> (i32, i32) {
    %c0_i32 = arith.constant 0 : i32
    %c0_i32_0 = arith.constant 0 : i32
    %c0_i32_1 = arith.constant 0 : i32
    return %c0_i32, %c0_i32_0 : i32, i32
  }
  func.func @transform_3(%arg0: i32, %arg1: i32, %arg2: i32) -> (i32, i32) {
    %c0_i32 = arith.constant 0 : i32
    return %arg2, %arg1 : i32, i32
  }
  func.func @transform_4(%arg0: i32, %arg1: i32, %arg2: i32) -> (i32, i32) {
    %c0_i32 = arith.constant 0 : i32
    %c0_i32_0 = arith.constant 0 : i32
    return %c0_i32, %arg1 : i32, i32
  }
  func.func @transform_5(%arg0: i32, %arg1: i32, %arg2: i32) -> (i32, i32) {
    %c0_i32 = arith.constant 0 : i32
    return %arg0, %arg1 : i32, i32
  }
}

</mosaic_0001>

<bundles_post_ra>
// kernel: tpu_custom_call.1
= control target key start
LH: loop header
LB: loop body
LE: loop exit
PB: predicated region body
PF: predicated region fallthrough
CT: control target
= control target key end

     0   :  { %10 = vsyncpa [#allocation5], 0  ;;  %s410_s0 = inlined_call_operand.hbm [shape: bf16[16,32], index: 0, kind: input, shape index: {}]   ;;  %s411_s1 = inlined_call_operand.vmem [shape: f32[1,32], index: 1, kind: input, shape index: {}]   ;;  %s412_s2 = inlined_call_operand.vmem [shape: f32[1,32], index: 2, kind: input, shape index: {}]   ;;  %s413_s3 = inlined_call_operand.hbm [shape: bf16[32,32], index: 3, kind: input, shape index: {}]   ;;  %s414_s4 = inlined_call_operand.vmem [shape: f32[1,32], index: 4, kind: input, shape index: {}]   ;;  %s415_s5 = inlined_call_operand.hbm [shape: f32[16,32], index: 5, kind: output, shape index: {}]  }
   0x1   :  { %11 = vsyncpa [#allocation8], 0 }
   0x2   :  { %12 = vsyncpa [#allocation6], 0  ;;  %s342_s18 = smov [#allocation4]  }
   0x3   :  { %s18_s19 = sshll.u32 %s342_s18, 4  ;;  %s19_s19 = int_to_ptr.vmem [resolvable:$true] %s18_s19 }
   0x4   :  { %s284_s20 = scalar_lea.vmem %s19_s19, 128  ;;  %p289_p1 = scmp.lt.s32.totalorder %s19_s19, %s19_s19 }
   0x5   :  { %p285_p0 = scmp.ne.s32.totalorder %s19_s19, %s284_s20  ;;  %p290_p2 = scmp.lt.s32.totalorder %s284_s20, %s284_s20 }
   0x7   :  { %p291_p3 = por %p290_p2, %p289_p1 }
   0x9   :  { %p292_p4 = pnand %p291_p3, %p285_p0 }
   0xb   :  { %295 = shalt.err (!%p292_p4)
}
   0xc   :  { %s343_s21 = smov 64   ;;  %s344_s22 = smov 4  }
   0xd   :  { %24 = dma.hbm_to_vmem [thread:$0]  %s410_s0, 128, %s19_s19, [#allocation5], %s343_s21, %s343_s21, %s344_s22  }
   0xe   :  { %s345_s25 = smov [#allocation7]  }
   0xf   :  { %s34_s26 = sshll.u32 %s345_s25, 4  ;;  %s35_s26 = int_to_ptr.vmem [resolvable:$true] %s34_s26 }
  0x10   :  { %s304_s27 = scalar_lea.vmem %s35_s26, 256  ;;  %p309_p6 = scmp.lt.s32.totalorder %s35_s26, %s35_s26 }
  0x11   :  { %p305_p5 = scmp.ne.s32.totalorder %s35_s26, %s304_s27  ;;  %p310_p7 = scmp.lt.s32.totalorder %s304_s27, %s304_s27 }
  0x13   :  { %p311_p8 = por %p310_p7, %p309_p6 }
  0x15   :  { %p312_p9 = pnand %p311_p8, %p305_p5 }
  0x17   :  { %315 = shalt.err (!%p312_p9)
}
  0x18   :  { %40 = dma.hbm_to_vmem [thread:$0]  %s413_s3, 256, %s35_s26, [#allocation8], %s343_s21, %s343_s21, %s344_s22  }
  0x19   :  { %336 = dma.done.wait [#allocation5], 128  }
  0x1a   :  { %337 = vsyncadd [#allocation5], 4294967168 }
  0x1b   :  { %338 = dma.done.wait [#allocation8], 256  }
  0x1c   :  { %339 = vsyncadd [#allocation8], 4294967040  ;;  %v246_v0 = vld [vmem:[#allocation4] sm:$0xff]   ;;  %vm60_vm0 = vcmask 261120   ;;  %v269_v15 = vld [vmem:[#allocation7 + $0x8] sm:$0xff]   ;;  %v346_v16 = vmov 0.0  }
  0x1d   :  { %v247_v1 = vunpack.c.l.bf16 %v246_v0  ;;  %v248_v2 = vunpack.c.h.bf16 %v246_v0  ;;  %121 = vst.msk [vmem:[#allocation3] sm:$0xff] %vm60_vm0, %v346_v16  ;;  %122 = vst.msk [vmem:[#allocation3 + $0x8] sm:$0xff] %vm60_vm0, %v346_v16  ;;  %252 = vmatprep.subr.bf16.mxu0 %v346_v16  ;;  %vm347_vm1 = vmmov 0   ;;  %v270_v17 = vld [vmem:[#allocation7] sm:$0xff]   ;;  %vm114_vm2 = vcmask 257024   ;;  %s348_s7 = smov [#allocation9]  }
  0x1e   :  { %256 = vmatprep.mubr.msk.bf16.mxu0 %vm347_vm1, %v346_v16  ;;  %253 = vmatpush3.bf16.msra.mxu0 %v269_v15  ;;  %v234_v25 = vld [vmem:[%s411_s1] ss:$0 sm:$0xff]  ;;  %s221_s8 = sshll.u32 %s348_s7, 4  ;;  %s222_s8 = int_to_ptr.vmem [resolvable:$true] %s221_s8 }
  0x1f   :  { %v61_v3 = vsel %vm60_vm0, %v247_v1, 0.0  ;;  %v64_v4 = vsel %vm60_vm0, %v248_v2, 0.0  ;;  %254 = vmatprep.subr.bf16.mxu0 %v346_v16  ;;  %v235_v27 = vld [vmem:[%s412_s2] ss:$0 sm:$0xff]  ;;  %s316_s9 = scalar_lea.vmem %s222_s8, 256  ;;  %p321_p11 = scmp.lt.s32.totalorder %s222_s8, %s222_s8 }
  0x20   :  { %62 = vadd.xlane.f32.xlu0 %v61_v3  ;;  %v242_v45 = vld [vmem:[%s414_s4] ss:$0 sm:$0xff]  ;;  %p317_p10 = scmp.ne.s32.totalorder %s222_s8, %s316_s9  ;;  %p322_p12 = scmp.lt.s32.totalorder %s316_s9, %s316_s9 }
  0x22   :  { %255 = vmatpush3.bf16.msra.mxu0 %v270_v17  ;;  %p323_p13 = por %p322_p12, %p321_p11 }
  0x24   :  { %65 = vadd.xlane.f32.xlu0 %v64_v4  ;;  %v123_v37 = vld [vmem:[#allocation3] sm:$0xff]  ;;  %v124_v41 = vld [vmem:[#allocation3 + $0x8] sm:$0xff]  ;;  %p324_p0 = pnand %p323_p13, %p317_p10 }
  0xa9   :  { %v63_v5 = vpop.xlane.xlu0 %62 }
  0xaa   :  { %v68_v6 = vmul.f32 0.03125, %v63_v5 }
  0xac   :  { %v70_v7 = vsub.f32 %v247_v1, %v68_v6 }
  0xad   :  { %v66_v8 = vpop.xlane.xlu0 %65 }
  0xae   :  { %v69_v9 = vmul.f32 0.03125, %v66_v8  ;;  %v72_v10 = vmul.f32 %v70_v7, %v70_v7 }
  0xb0   :  { %v71_v11 = vsub.f32 %v248_v2, %v69_v9  ;;  %v74_v12 = vsel %vm60_vm0, %v72_v10, 0.0 }
  0xb1   :  { %75 = vadd.xlane.f32.xlu1 %v74_v12 }
  0xb2   :  { %v73_v13 = vmul.f32 %v71_v11, %v71_v11 }
  0xb4   :  { %v77_v14 = vsel %vm60_vm0, %v73_v13, 0.0 }
  0xb5   :  { %78 = vadd.xlane.f32.xlu1 %v77_v14 }
 0x13a   :  { %v76_v18 = vpop.xlane.xlu1 %75 }
 0x13b   :  { %v80_v19 = vmul.f32 0.03125, %v76_v18 }
 0x13d   :  { %v82_v20 = vadd.f32 1e-05, %v80_v19 }
 0x13e   :  { %v79_v21 = vpop.xlane.xlu1 %78 }
 0x13f   :  { %272 = vrsqrt.f32 %v82_v20  ;;  %v81_v22 = vmul.f32 0.03125, %v79_v21 }
 0x141   :  { %v83_v23 = vadd.f32 1e-05, %v81_v22 }
 0x143   :  { %274 = vrsqrt.f32 %v83_v23 }
 0x14c   :  { %v273_v24 = vpop.eup %272 }
 0x14d   :  { %v86_v26 = vmul.f32 %v273_v24, %v70_v7 }
 0x14f   :  { %v95_v28 = vmul.f32 %v234_v25, %v86_v26 }
 0x150   :  { %v275_v29 = vpop.eup %274 }
 0x151   :  { %v104_v30 = vadd.f32 %v235_v27, %v95_v28  ;;  %v87_v31 = vmul.f32 %v275_v29, %v71_v11 }
 0x153   :  { %v243_v32 = vpack.c.bf16 %v104_v30, %v104_v30  ;;  %v96_v33 = vmul.f32 %v234_v25, %v87_v31 }
 0x155   :  { %115 = vst.msk [vmem:[#allocation2] sm:$0xf] %vm114_vm2, %v243_v32  ;;  %v105_v34 = vadd.f32 %v235_v27, %v96_v33 }
 0x157   :  { %v244_v35 = vpack.c.bf16 %v105_v34, %v105_v34 }
 0x159   :  { %116 = vst.msk [vmem:[#allocation2 + $0x4] sm:$0xf] %vm114_vm2, %v244_v35 }
 0x160   :  { %v271_v36 = vld [vmem:[#allocation2] sm:$0xff]  }
 0x161   :  { %257 = vmatmul.mubr.msk.bf16.vlgmr.msra.gmra.mxu0 %vm60_vm0, %v271_v36 }
 0x221   :  { %v189_v38 = vpop.f32.mrf.mxu0 }
 0x222   :  { %v196_v39 = vadd.f32 %v189_v38, %v123_v37 }
 0x223   :  { %v258_v40 = vpop.f32.mrf.mxu0 }
 0x224   :  { %198 = vst.msk [vmem:[#allocation3] sm:$0xff] %vm60_vm0, %v196_v39 }
 0x225   :  { %v192_v42 = vpop.f32.mrf.mxu0 }
 0x226   :  { %v197_v43 = vadd.f32 %v192_v42, %v124_v41 }
 0x227   :  { %v259_v44 = vpop.f32.mrf.mxu0 }
 0x228   :  { %199 = vst.msk [vmem:[#allocation3 + $0x8] sm:$0xff] %vm60_vm0, %v197_v43 }
 0x22b   :  { %v203_v46 = vld [vmem:[#allocation3] sm:$0xff] }
 0x22c   :  { %v212_v47 = vadd.f32 %v242_v45, %v203_v46 }
 0x22e   :  { %214 = vst.msk [vmem:[#allocation9] sm:$0xff] %vm60_vm0, %v212_v47 }
 0x22f   :  { %v204_v48 = vld [vmem:[#allocation3 + $0x8] sm:$0xff] }
 0x230   :  { %v213_v49 = vadd.f32 %v242_v45, %v204_v48 }
 0x232   :  { %215 = vst.msk [vmem:[#allocation9 + $0x8] sm:$0xff] %vm60_vm0, %v213_v49 }
 0x233   :  { %327 = shalt.err (!%p324_p0)
}
 0x234   :  { %s349_s10 = smov 128   ;;  %s350_s4 = smov 8  }
 0x235   :  { %227 = dma.vmem_to_hbm [thread:$0]  %s222_s8, 256, %s415_s5, [#allocation6], %s349_s10, %s349_s10, %s350_s4  }
 0x236   :  { %340 = dma.done.wait [#allocation6], 256  }
 0x237   :  { %341 = vsyncadd [#allocation6], 4294967040 }
 0x238   :  { %231 = vsyncpa [#allocation5], 1 }
 0x239   :  { %232 = vsyncpa [#allocation8], 1 }
 0x23a   :  { %233 = vsyncpa [#allocation6], 1 }

</bundles_post_ra>
